<compile_context>
chip_gen: v5e
topology: v5e:2x2
jax: 0.10.0
libtpu: 0.0.40
codegen_flags: <defaults>
</compile_context>

<pallas_src>
import jax
import jax.numpy as jnp
from jax.experimental import pallas as pl
from jax.experimental.pallas import tpu as pltpu


def mlp_kernel(x_ref, w1_ref, b1_ref, w2_ref, b2_ref, w3_ref, b3_ref, o_ref):
    # x_ref : (tb, in_features)     activation tile for this grid step
    # wN/bN : full (small) weight / bias arrays, VMEM-resident across the grid
    # o_ref : (tb, out_features)
    x = x_ref[...]
    h = jnp.maximum(
        jnp.dot(x, w1_ref[...], preferred_element_type=jnp.float32) + b1_ref[...], 0.0
    )
    h = jnp.maximum(
        jnp.dot(h, w2_ref[...], preferred_element_type=jnp.float32) + b2_ref[...], 0.0
    )
    h = jnp.maximum(
        jnp.dot(h, w3_ref[...], preferred_element_type=jnp.float32) + b3_ref[...], 0.0
    )
    o_ref[...] = h.astype(o_ref.dtype)


def _round_up(n, m):
    return -(-n // m) * m


def _choose_tb(batch):
    """Batch-tile size (rows). Big tiles amortize per-step overhead; cap at
    ~batch/4 so large batches keep >= 4 grid steps (v7x dual-TC sharding),
    and cap at 2048 rows (VMEM stays tiny, well under every generation's
    default scoped-VMEM limit since features are unpadded)."""
    if batch <= 64:
        return _round_up(max(batch, 1), 8)
    tb = _round_up(-(-batch // 4), 8)
    return max(64, min(tb, 2048))


def simple_mlp_forward(x, params):
    w1, b1, w2, b2, w3, b3 = params
    batch, in_features = x.shape
    out_features = w3.shape[1]

    tb = _choose_tb(batch)
    grid = (pl.cdiv(batch, tb),)

    def full_spec(arr):
        # Full-array block with a constant index map -> fetched once, stays in VMEM.
        return pl.BlockSpec(arr.shape, lambda i: (0, 0))

    return pl.pallas_call(
        mlp_kernel,
        out_shape=jax.ShapeDtypeStruct((batch, out_features), x.dtype),
        grid=grid,
        in_specs=[
            pl.BlockSpec((tb, in_features), lambda i: (i, 0)),  # streamed activations
            full_spec(w1), full_spec(b1),
            full_spec(w2), full_spec(b2),
            full_spec(w3), full_spec(b3),
        ],
        out_specs=pl.BlockSpec((tb, out_features), lambda i: (i, 0)),
        compiler_params=pltpu.CompilerParams(
            dimension_semantics=("parallel",),
        ),
    )(x, w1, b1, w2, b2, w3, b3)


def init_params(key, input_size=4, hidden_size=20, output_size=3):
    """Deterministic init mirroring nn.Linear's uniform(-1/sqrt(fan_in), 1/sqrt(fan_in))."""
    ks = jax.random.split(key, 6)

    def linear(kw, kb, fan_in, fan_out):
        bound = 1.0 / jnp.sqrt(float(fan_in))
        w = jax.random.uniform(kw, (fan_in, fan_out), jnp.float32, -bound, bound)
        b = jax.random.uniform(kb, (1, fan_out), jnp.float32, -bound, bound)
        return w, b

    w1, b1 = linear(ks[0], ks[1], input_size, hidden_size)
    w2, b2 = linear(ks[2], ks[3], hidden_size, hidden_size)
    w3, b3 = linear(ks[4], ks[5], hidden_size, output_size)
    return (w1, b1, w2, b2, w3, b3)


def reference_forward(x, params):
    w1, b1, w2, b2, w3, b3 = params
    h = jnp.maximum(x @ w1 + b1, 0.0)
    h = jnp.maximum(h @ w2 + b2, 0.0)
    h = jnp.maximum(h @ w3 + b3, 0.0)
    return h


if __name__ == "__main__":
    key = jax.random.PRNGKey(0)
    k_x, k_p = jax.random.split(key)

    batch, input_size, hidden_size, output_size = 8, 4, 20, 3
    params = init_params(k_p, input_size, hidden_size, output_size)

    # Small demo batch (single tile).
    x = jax.random.normal(k_x, (batch, input_size), dtype=jnp.float32)
    out = jax.block_until_ready(simple_mlp_forward(x, params))
    ref = reference_forward(x, params)
    assert out.shape == (batch, output_size)
    assert jnp.allclose(out, ref, atol=1e-5, rtol=1e-5)

    # Larger, non-tile-multiple batch: exercises the multi-step parallel grid
    # and the masked writeback of the ragged last tile.
    x_big = jax.random.normal(k_x, (300, input_size), dtype=jnp.float32)
    out_big = jax.block_until_ready(simple_mlp_forward(x_big, params))
    ref_big = reference_forward(x_big, params)
    assert out_big.shape == (300, output_size)
    assert jnp.allclose(out_big, ref_big, atol=1e-5, rtol=1e-5)

    print("KERNEL_OK")
</pallas_src>

<mosaic_0001>
module attributes {stable_mosaic.version = 11 : i64} {
  func.func @mlp_kernel(%arg0: i32, %arg1: memref<8x4xf32, #tpu.memory_space<vmem>>, %arg2: memref<4x20xf32, #tpu.memory_space<vmem>>, %arg3: memref<1x20xf32, #tpu.memory_space<vmem>>, %arg4: memref<20x20xf32, #tpu.memory_space<vmem>>, %arg5: memref<1x20xf32, #tpu.memory_space<vmem>>, %arg6: memref<20x3xf32, #tpu.memory_space<vmem>>, %arg7: memref<1x3xf32, #tpu.memory_space<vmem>>, %arg8: memref<8x3xf32, #tpu.memory_space<vmem>>) attributes {dimension_semantics = [#tpu.dimension_semantics<parallel>], iteration_bounds = array<i64: 1>, scalar_prefetch = 0 : i64, scratch_operands = 0 : i64, tpu.core_type = #tpu.core_type<tc>, window_params = [{transform_indices = @transform_0, window_bounds = array<i64: 8, 4>}, {pipeline_mode = #tpu.pipeline_mode<synchronous>, transform_indices = @transform_1, window_bounds = array<i64: 4, 20>}, {pipeline_mode = #tpu.pipeline_mode<synchronous>, transform_indices = @transform_2, window_bounds = array<i64: 1, 20>}, {pipeline_mode = #tpu.pipeline_mode<synchronous>, transform_indices = @transform_3, window_bounds = array<i64: 20, 20>}, {pipeline_mode = #tpu.pipeline_mode<synchronous>, transform_indices = @transform_4, window_bounds = array<i64: 1, 20>}, {pipeline_mode = #tpu.pipeline_mode<synchronous>, transform_indices = @transform_5, window_bounds = array<i64: 20, 3>}, {pipeline_mode = #tpu.pipeline_mode<synchronous>, transform_indices = @transform_6, window_bounds = array<i64: 1, 3>}, {transform_indices = @transform_7, window_bounds = array<i64: 8, 3>}]} {
    %c0 = arith.constant 0 : index
    %c0_0 = arith.constant 0 : index
    %0 = vector.load %arg1[%c0, %c0_0] : memref<8x4xf32, #tpu.memory_space<vmem>>, vector<8x4xf32>
    %c0_1 = arith.constant 0 : index
    %c0_2 = arith.constant 0 : index
    %1 = vector.load %arg2[%c0_1, %c0_2] : memref<4x20xf32, #tpu.memory_space<vmem>>, vector<4x20xf32>
    %cst = arith.constant dense<0.000000e+00> : vector<8x20xf32>
    %2 = tpu.matmul %0, %1, %cst {dimension_numbers = #tpu.dot_dimension_numbers<[1], [0], [0], [1], [0, 0, 1, 1], [], []>} : vector<8x4xf32>, vector<4x20xf32>, vector<8x20xf32> -> vector<8x20xf32>
    %c0_3 = arith.constant 0 : index
    %c0_4 = arith.constant 0 : index
    %3 = vector.load %arg3[%c0_3, %c0_4] : memref<1x20xf32, #tpu.memory_space<vmem>>, vector<1x20xf32>
    %4 = vector.broadcast %3 : vector<1x20xf32> to vector<8x20xf32>
    %5 = arith.addf %2, %4 : vector<8x20xf32>
    %cst_5 = arith.constant 0.000000e+00 : f32
    %6 = vector.broadcast %cst_5 : f32 to vector<8x20xf32>
    %7 = arith.maximumf %5, %6 : vector<8x20xf32>
    %c0_6 = arith.constant 0 : index
    %c0_7 = arith.constant 0 : index
    %8 = vector.load %arg4[%c0_6, %c0_7] : memref<20x20xf32, #tpu.memory_space<vmem>>, vector<20x20xf32>
    %cst_8 = arith.constant dense<0.000000e+00> : vector<8x20xf32>
    %9 = tpu.matmul %7, %8, %cst_8 {dimension_numbers = #tpu.dot_dimension_numbers<[1], [0], [0], [1], [0, 0, 1, 1], [], []>} : vector<8x20xf32>, vector<20x20xf32>, vector<8x20xf32> -> vector<8x20xf32>
    %c0_9 = arith.constant 0 : index
    %c0_10 = arith.constant 0 : index
    %10 = vector.load %arg5[%c0_9, %c0_10] : memref<1x20xf32, #tpu.memory_space<vmem>>, vector<1x20xf32>
    %11 = vector.broadcast %10 : vector<1x20xf32> to vector<8x20xf32>
    %12 = arith.addf %9, %11 : vector<8x20xf32>
    %cst_11 = arith.constant 0.000000e+00 : f32
    %13 = vector.broadcast %cst_11 : f32 to vector<8x20xf32>
    %14 = arith.maximumf %12, %13 : vector<8x20xf32>
    %c0_12 = arith.constant 0 : index
    %c0_13 = arith.constant 0 : index
    %15 = vector.load %arg6[%c0_12, %c0_13] : memref<20x3xf32, #tpu.memory_space<vmem>>, vector<20x3xf32>
    %cst_14 = arith.constant dense<0.000000e+00> : vector<8x3xf32>
    %16 = tpu.matmul %14, %15, %cst_14 {dimension_numbers = #tpu.dot_dimension_numbers<[1], [0], [0], [1], [0, 0, 1, 1], [], []>} : vector<8x20xf32>, vector<20x3xf32>, vector<8x3xf32> -> vector<8x3xf32>
    %c0_15 = arith.constant 0 : index
    %c0_16 = arith.constant 0 : index
    %17 = vector.load %arg7[%c0_15, %c0_16] : memref<1x3xf32, #tpu.memory_space<vmem>>, vector<1x3xf32>
    %18 = vector.broadcast %17 : vector<1x3xf32> to vector<8x3xf32>
    %19 = arith.addf %16, %18 : vector<8x3xf32>
    %cst_17 = arith.constant 0.000000e+00 : f32
    %20 = vector.broadcast %cst_17 : f32 to vector<8x3xf32>
    %21 = arith.maximumf %19, %20 : vector<8x3xf32>
    %c0_18 = arith.constant 0 : index
    %c0_19 = arith.constant 0 : index
    %22 = vector.load %arg8[%c0_18, %c0_19] : memref<8x3xf32, #tpu.memory_space<vmem>>, vector<8x3xf32>
    tpu.vector_store %arg8[%c0_18, %c0_19], %21 {strides = array<i32>} : memref<8x3xf32, #tpu.memory_space<vmem>>, vector<8x3xf32>,
    return
  }
  func.func @transform_0(%arg0: i32) -> (i32, i32) {
    %c0_i32 = arith.constant 0 : i32
    %c0_i32_0 = arith.constant 0 : i32
    return %arg0, %c0_i32 : i32, i32
  }
  func.func @transform_1(%arg0: i32) -> (i32, i32) {
    %c0_i32 = arith.constant 0 : i32
    %c0_i32_0 = arith.constant 0 : i32
    %c0_i32_1 = arith.constant 0 : i32
    return %c0_i32, %c0_i32_0 : i32, i32
  }
  func.func @transform_2(%arg0: i32) -> (i32, i32) {
    %c0_i32 = arith.constant 0 : i32
    %c0_i32_0 = arith.constant 0 : i32
    %c0_i32_1 = arith.constant 0 : i32
    return %c0_i32, %c0_i32_0 : i32, i32
  }
  func.func @transform_3(%arg0: i32) -> (i32, i32) {
    %c0_i32 = arith.constant 0 : i32
    %c0_i32_0 = arith.constant 0 : i32
    %c0_i32_1 = arith.constant 0 : i32
    return %c0_i32, %c0_i32_0 : i32, i32
  }
  func.func @transform_4(%arg0: i32) -> (i32, i32) {
    %c0_i32 = arith.constant 0 : i32
    %c0_i32_0 = arith.constant 0 : i32
    %c0_i32_1 = arith.constant 0 : i32
    return %c0_i32, %c0_i32_0 : i32, i32
  }
  func.func @transform_5(%arg0: i32) -> (i32, i32) {
    %c0_i32 = arith.constant 0 : i32
    %c0_i32_0 = arith.constant 0 : i32
    %c0_i32_1 = arith.constant 0 : i32
    return %c0_i32, %c0_i32_0 : i32, i32
  }
  func.func @transform_6(%arg0: i32) -> (i32, i32) {
    %c0_i32 = arith.constant 0 : i32
    %c0_i32_0 = arith.constant 0 : i32
    %c0_i32_1 = arith.constant 0 : i32
    return %c0_i32, %c0_i32_0 : i32, i32
  }
  func.func @transform_7(%arg0: i32) -> (i32, i32) {
    %c0_i32 = arith.constant 0 : i32
    %c0_i32_0 = arith.constant 0 : i32
    return %arg0, %c0_i32 : i32, i32
  }
}

</mosaic_0001>

<bundles_post_ra>
// kernel: tpu_custom_call.1
= control target key start
LH: loop header
LB: loop body
LE: loop exit
PB: predicated region body
PF: predicated region fallthrough
CT: control target
= control target key end

     0   :  { %vm36_vm0 = vcmask 1043456   ;;  %vm32_vm1 = vcmask 31744   ;;  %vm68_vm2 = vcmask 162816   ;;  %vm130_vm3 = vcmask 23552   ;;  %s224_s1 = inlined_call_operand.vmem [shape: f32[4,20], index: 1, kind: input, shape index: {}]   ;;  %s225_s0 = inlined_call_operand.vmem [shape: f32[8,4], index: 0, kind: input, shape index: {}]   ;;  %s226_s2 = inlined_call_operand.vmem [shape: f32[1,20], index: 2, kind: input, shape index: {}]   ;;  %s227_s4 = inlined_call_operand.vmem [shape: f32[1,20], index: 4, kind: input, shape index: {}]   ;;  %s228_s3 = inlined_call_operand.vmem [shape: f32[20,20], index: 3, kind: input, shape index: {}]   ;;  %s229_s6 = inlined_call_operand.vmem [shape: f32[1,3], index: 6, kind: input, shape index: {}]   ;;  %s230_s5 = inlined_call_operand.vmem [shape: f32[20,3], index: 5, kind: input, shape index: {}]   ;;  %s231_s7 = inlined_call_operand.vmem [shape: f32[8,3], index: 7, kind: output, shape index: {}]  }
   0x1   :  { %v27_v0 = vld [vmem:[%s224_s1] sm:$0xf]  ;;  %v63_v2 = vld [vmem:[%s228_s3 + $0x10] sm:$0xf]  ;;  %v62_v3 = vld [vmem:[%s228_s3 + $0x8] sm:$0xff] }
   0x2   :  { %v26_v1 = vld [vmem:[%s225_s0] sm:$0xff]  ;;  %136 = vmatpush.msk.msra.mxu0 %vm36_vm0, %v27_v0  ;;  %138 = vmatpush.msk.msra.mxu1 %vm36_vm0, %v63_v2  ;;  %v98_v9 = vld [vmem:[%s230_s5 + $0x10] sm:$0xf]  ;;  %v97_v10 = vld [vmem:[%s230_s5 + $0x8] sm:$0xff] }
   0x3   :  { %137 = vmatmul.msk.f32.vlgmr.msra.gmra.mxu0 %vm32_vm1, %v26_v1  ;;  %v61_v4 = vld [vmem:[%s228_s3] sm:$0xff]  ;;  %140 = vmatpush.msk.msra.mxu2 %vm36_vm0, %v98_v9 }
   0x4   :  { %89 = vmatpush.msra.mxu1 %v62_v3  ;;  %v142_v5 = vld [vmem:[%s226_s2] ss:$0 sm:$0xff] }
   0x5   :  { %123 = vmatpush.msra.mxu2 %v97_v10  ;;  %v96_v11 = vld [vmem:[%s230_s5] sm:$0xff] }
   0x6   :  { %90 = vmatpush.msra.mxu1 %v61_v4  ;;  %v143_v12 = vld [vmem:[%s227_s4] ss:$0 sm:$0xff] }
   0x7   :  { %124 = vmatpush.msra.mxu2 %v96_v11  ;;  %v144_v16 = vld [vmem:[%s229_s6] ss:$0 sm:$0xff] }
  0x80   :  { %v57_v6 = vpop.f32.mrf.mxu0 }
  0x81   :  { %v58_v7 = vadd.f32 %v142_v5, %v57_v6 }
  0x83   :  { %v60_v8 = vmax.f32 %v58_v7, 0.0 }
  0x85   :  { %139 = vmatmul.msk.f32.vlgmr.msra.gmra.mxu1 %vm68_vm2, %v60_v8 }
 0x102   :  { %v92_v13 = vpop.f32.mrf.mxu1 }
 0x103   :  { %v93_v14 = vadd.f32 %v143_v12, %v92_v13 }
 0x105   :  { %v95_v15 = vmax.f32 %v93_v14, 0.0 }
 0x107   :  { %141 = vmatmul.msk.f32.vlgmr.msra.gmra.mxu2 %vm68_vm2, %v95_v15 }
 0x18a   :  { %v126_v17 = vpop.f32.mrf.mxu2 }
 0x18b   :  { %v127_v18 = vadd.f32 %v144_v16, %v126_v17 }
 0x18d   :  { %v129_v19 = vmax.f32 %v127_v18, 0.0 }
 0x18f   :  { %131 = vst.msk [vmem:[%s231_s7] sm:$0xff] %vm130_vm3, %v129_v19 }

</bundles_post_ra>
